<compile_context>
chip_gen: v7x
topology: tpu7x:2x2x1
jax: 0.10.0
libtpu: 0.0.40
codegen_flags: <defaults>
</compile_context>

<pallas_src>
import functools
import math

import jax
import jax.numpy as jnp
from jax.experimental import pallas as pl
from jax.experimental.pallas import tpu as pltpu


def qnetwork_kernel(x_ref, w1_ref, b1_ref, w2_ref, b2_ref, w3_ref, b3_ref,
                    o_ref):
    # x_ref: (S+A, tb) feature-major batch tile; activations stay (H, tb).
    h1 = jnp.dot(w1_ref[...], x_ref[...],
                 preferred_element_type=jnp.float32)          # (H, tb)
    h1 = jnp.maximum(h1 + b1_ref[...], 0.0)                   # bias (H,1) bcast

    h2 = jnp.dot(w2_ref[...], h1,
                 preferred_element_type=jnp.float32)          # (H, tb)
    h2 = jnp.maximum(h2 + b2_ref[...], 0.0)

    # fc3: (1, H) @ (H, tb) -> (1, tb): lane-dense row, no transpose needed.
    q = jnp.dot(w3_ref[...], h2, preferred_element_type=jnp.float32)
    o_ref[...] = (q + b3_ref[0]).astype(o_ref.dtype)


def _round_up(x, m):
    return (x + m - 1) // m * m


def _num_tensorcores():
    """Best-effort TensorCores-per-chip: 2 on v7x, 1 on v5e/v6e."""
    try:
        kind = jax.devices()[0].device_kind.lower()
    except Exception:
        return 1
    return 2 if ("v7" in kind or "7x" in kind) else 1


@functools.partial(jax.jit, static_argnames=("num_tiles", "max_tile_b"))
def qnetwork_forward(state, action, params, num_tiles=1, max_tile_b=2048):
    """state: (B, S) f32, action: (B, A) f32 -> q: (B, 1) f32."""
    w1, b1, w2, b2, w3, b3 = params
    B, S = state.shape
    A = action.shape[1]
    H = w2.shape[0]

    # As few grid steps as possible (step overhead dominates), but at least
    # `num_tiles` (>= #TCs so v7x can shard the parallel axis), and cap the
    # per-tile batch to keep VMEM modest.  tb is a multiple of 128 so every
    # block is lane-dense.
    num_tiles = max(int(num_tiles), -(-B // int(max_tile_b)))
    pad_b = _round_up(B, num_tiles * 128)
    tb = pad_b // num_tiles

    # Pack [state, action] once (16 B/row) and go feature-major: (S+A, pad_b).
    x = jnp.concatenate([state, action], axis=1)
    if pad_b != B:
        x = jnp.pad(x, ((0, pad_b - B), (0, 0)))
    x_t = x.T

    # Weights/biases: same block every grid step -> VMEM-resident.
    resident = lambda shape: pl.BlockSpec(shape, lambda i: (0, 0))

    out = pl.pallas_call(
        qnetwork_kernel,
        out_shape=jax.ShapeDtypeStruct((1, pad_b), jnp.float32),
        grid_spec=pltpu.PrefetchScalarGridSpec(
            num_scalar_prefetch=0,
            grid=(num_tiles,),
            in_specs=[
                pl.BlockSpec((S + A, tb), lambda i: (0, i)),        # x tile
                resident((H, S + A)),                               # W1
                resident((H, 1)),                                   # b1
                resident((H, H)),                                   # W2
                resident((H, 1)),                                   # b2
                resident((1, H)),                                   # W3
                pl.BlockSpec(memory_space=pltpu.MemorySpace.SMEM),  # b3 scalar
            ],
            out_specs=pl.BlockSpec((1, tb), lambda i: (0, i)),
        ),
        compiler_params=pltpu.CompilerParams(
            dimension_semantics=("parallel",)),
    )(x_t, w1, b1, w2, b2, w3, b3)

    return out[0, :B].reshape(B, 1)


def init_params(key, state_size, action_size, hidden_size=256):
    """nn.Linear default init (uniform +/- 1/sqrt(fan_in)), fp32.

    Weights are kept in torch's (out_features, in_features) layout, which is
    exactly the feature-major layout the kernel consumes:
      w1 (H, S+A), b1 (H, 1), w2 (H, H), b2 (H, 1), w3 (1, H), b3 (1,)
    """
    d_in = state_size + action_size
    ks = jax.random.split(key, 6)

    def lin(kw, kb, fan_in, fan_out):
        bound = 1.0 / math.sqrt(fan_in)
        w = jax.random.uniform(kw, (fan_out, fan_in), jnp.float32, -bound, bound)
        b = jax.random.uniform(kb, (fan_out,), jnp.float32, -bound, bound)
        return w, b

    w1, b1 = lin(ks[0], ks[1], d_in, hidden_size)
    w2, b2 = lin(ks[2], ks[3], hidden_size, hidden_size)
    w3, b3 = lin(ks[4], ks[5], hidden_size, 1)

    return (w1,
            b1.reshape(hidden_size, 1),
            w2,
            b2.reshape(hidden_size, 1),
            w3,
            b3)


def qnetwork_reference(state, action, params):
    """Pure-JAX fp32 reference mirroring the PyTorch forward."""
    w1, b1, w2, b2, w3, b3 = params
    x = jnp.concatenate([state, action], axis=1)
    h1 = jnp.maximum(x @ w1.T + b1[:, 0], 0.0)
    h2 = jnp.maximum(h1 @ w2.T + b2[:, 0], 0.0)
    return h2 @ w3.T + b3


if __name__ == "__main__":
    # Pendulum-v1: state_size = 3, action_size = 1; module default hidden=256.
    state_size, action_size, hidden_size = 3, 1, 256
    batch = 128   # multiple of 128 -> no padding on 1-TC chips

    key = jax.random.PRNGKey(0)
    k_params, k_state, k_action = jax.random.split(key, 3)

    params = init_params(k_params, state_size, action_size, hidden_size)
    state = jax.random.normal(k_state, (batch, state_size), jnp.float32)
    action = jax.random.normal(k_action, (batch, action_size), jnp.float32)

    q = qnetwork_forward(state, action, params, num_tiles=_num_tensorcores())
    q = jax.block_until_ready(q)

    q_ref = qnetwork_reference(state, action, params)
    assert q.shape == (batch, 1)
    max_err = float(jnp.max(jnp.abs(q - q_ref)))
    assert jnp.allclose(q, q_ref, atol=1e-2, rtol=1e-2), max_err

    print("KERNEL_OK")
</pallas_src>

<mosaic_0001>
module attributes {stable_mosaic.version = 11 : i64} {
  func.func @qnetwork_kernel(%arg0: i32, %arg1: memref<4x128xf32, #tpu.memory_space<vmem>>, %arg2: memref<256x4xf32, #tpu.memory_space<vmem>>, %arg3: memref<256x1xf32, #tpu.memory_space<vmem>>, %arg4: memref<256x256xf32, #tpu.memory_space<vmem>>, %arg5: memref<256x1xf32, #tpu.memory_space<vmem>>, %arg6: memref<1x256xf32, #tpu.memory_space<vmem>>, %arg7: memref<1xf32, #tpu.memory_space<smem>>, %arg8: memref<1x128xf32, #tpu.memory_space<vmem>>) attributes {dimension_semantics = [#tpu.dimension_semantics<parallel>], iteration_bounds = array<i64: 1>, scalar_prefetch = 0 : i64, scratch_operands = 0 : i64, tpu.core_type = #tpu.core_type<tc>, window_params = [{transform_indices = @transform_0, window_bounds = array<i64: 4, 128>}, {pipeline_mode = #tpu.pipeline_mode<synchronous>, transform_indices = @transform_1, window_bounds = array<i64: 256, 4>}, {pipeline_mode = #tpu.pipeline_mode<synchronous>, transform_indices = @transform_2, window_bounds = array<i64: 256, 1>}, {pipeline_mode = #tpu.pipeline_mode<synchronous>, transform_indices = @transform_3, window_bounds = array<i64: 256, 256>}, {pipeline_mode = #tpu.pipeline_mode<synchronous>, transform_indices = @transform_4, window_bounds = array<i64: 256, 1>}, {pipeline_mode = #tpu.pipeline_mode<synchronous>, transform_indices = @transform_5, window_bounds = array<i64: 1, 256>}, {transform_indices = @transform_6, window_bounds = array<i64: 1>}, {transform_indices = @transform_7, window_bounds = array<i64: 1, 128>}]} {
    %c0 = arith.constant 0 : index
    %c0_0 = arith.constant 0 : index
    %0 = vector.load %arg2[%c0, %c0_0] : memref<256x4xf32, #tpu.memory_space<vmem>>, vector<256x4xf32>
    %c0_1 = arith.constant 0 : index
    %c0_2 = arith.constant 0 : index
    %1 = vector.load %arg1[%c0_1, %c0_2] : memref<4x128xf32, #tpu.memory_space<vmem>>, vector<4x128xf32>
    %cst = arith.constant dense<0.000000e+00> : vector<256x128xf32>
    %2 = tpu.matmul %0, %1, %cst {dimension_numbers = #tpu.dot_dimension_numbers<[1], [0], [0], [1], [0, 0, 1, 1], [], []>} : vector<256x4xf32>, vector<4x128xf32>, vector<256x128xf32> -> vector<256x128xf32>
    %c0_3 = arith.constant 0 : index
    %c0_4 = arith.constant 0 : index
    %3 = vector.load %arg3[%c0_3, %c0_4] : memref<256x1xf32, #tpu.memory_space<vmem>>, vector<256x1xf32>
    %4 = vector.broadcast %3 : vector<256x1xf32> to vector<256x128xf32>
    %5 = arith.addf %2, %4 : vector<256x128xf32>
    %cst_5 = arith.constant 0.000000e+00 : f32
    %6 = vector.broadcast %cst_5 : f32 to vector<256x128xf32>
    %7 = arith.maximumf %5, %6 : vector<256x128xf32>
    %c0_6 = arith.constant 0 : index
    %c0_7 = arith.constant 0 : index
    %8 = vector.load %arg4[%c0_6, %c0_7] : memref<256x256xf32, #tpu.memory_space<vmem>>, vector<256x256xf32>
    %cst_8 = arith.constant dense<0.000000e+00> : vector<256x128xf32>
    %9 = tpu.matmul %8, %7, %cst_8 {dimension_numbers = #tpu.dot_dimension_numbers<[1], [0], [0], [1], [0, 0, 1, 1], [], []>} : vector<256x256xf32>, vector<256x128xf32>, vector<256x128xf32> -> vector<256x128xf32>
    %c0_9 = arith.constant 0 : index
    %c0_10 = arith.constant 0 : index
    %10 = vector.load %arg5[%c0_9, %c0_10] : memref<256x1xf32, #tpu.memory_space<vmem>>, vector<256x1xf32>
    %11 = vector.broadcast %10 : vector<256x1xf32> to vector<256x128xf32>
    %12 = arith.addf %9, %11 : vector<256x128xf32>
    %cst_11 = arith.constant 0.000000e+00 : f32
    %13 = vector.broadcast %cst_11 : f32 to vector<256x128xf32>
    %14 = arith.maximumf %12, %13 : vector<256x128xf32>
    %c0_12 = arith.constant 0 : index
    %c0_13 = arith.constant 0 : index
    %15 = vector.load %arg6[%c0_12, %c0_13] : memref<1x256xf32, #tpu.memory_space<vmem>>, vector<1x256xf32>
    %cst_14 = arith.constant dense<0.000000e+00> : vector<1x128xf32>
    %16 = tpu.matmul %15, %14, %cst_14 {dimension_numbers = #tpu.dot_dimension_numbers<[1], [0], [0], [1], [0, 0, 1, 1], [], []>} : vector<1x256xf32>, vector<256x128xf32>, vector<1x128xf32> -> vector<1x128xf32>
    %c0_15 = arith.constant 0 : index
    %17 = memref.load %arg7[%c0_15] : memref<1xf32, #tpu.memory_space<smem>>
    %18 = vector.broadcast %17 : f32 to vector<1x128xf32>
    %19 = arith.addf %16, %18 : vector<1x128xf32>
    %c0_16 = arith.constant 0 : index
    %c0_17 = arith.constant 0 : index
    %20 = vector.load %arg8[%c0_16, %c0_17] : memref<1x128xf32, #tpu.memory_space<vmem>>, vector<1x128xf32>
    tpu.vector_store %arg8[%c0_16, %c0_17], %19 {strides = array<i32>} : memref<1x128xf32, #tpu.memory_space<vmem>>, vector<1x128xf32>,
    return
  }
  func.func @transform_0(%arg0: i32) -> (i32, i32) {
    %c0_i32 = arith.constant 0 : i32
    %c0_i32_0 = arith.constant 0 : i32
    return %c0_i32, %arg0 : i32, i32
  }
  func.func @transform_1(%arg0: i32) -> (i32, i32) {
    %c0_i32 = arith.constant 0 : i32
    %c0_i32_0 = arith.constant 0 : i32
    %c0_i32_1 = arith.constant 0 : i32
    return %c0_i32, %c0_i32_0 : i32, i32
  }
  func.func @transform_2(%arg0: i32) -> (i32, i32) {
    %c0_i32 = arith.constant 0 : i32
    %c0_i32_0 = arith.constant 0 : i32
    %c0_i32_1 = arith.constant 0 : i32
    return %c0_i32, %c0_i32_0 : i32, i32
  }
  func.func @transform_3(%arg0: i32) -> (i32, i32) {
    %c0_i32 = arith.constant 0 : i32
    %c0_i32_0 = arith.constant 0 : i32
    %c0_i32_1 = arith.constant 0 : i32
    return %c0_i32, %c0_i32_0 : i32, i32
  }
  func.func @transform_4(%arg0: i32) -> (i32, i32) {
    %c0_i32 = arith.constant 0 : i32
    %c0_i32_0 = arith.constant 0 : i32
    %c0_i32_1 = arith.constant 0 : i32
    return %c0_i32, %c0_i32_0 : i32, i32
  }
  func.func @transform_5(%arg0: i32) -> (i32, i32) {
    %c0_i32 = arith.constant 0 : i32
    %c0_i32_0 = arith.constant 0 : i32
    %c0_i32_1 = arith.constant 0 : i32
    return %c0_i32, %c0_i32_0 : i32, i32
  }
  func.func @transform_6(%arg0: i32) -> i32 {
    %c0_i32 = arith.constant 0 : i32
    %c0_i32_0 = arith.constant 0 : i32
    return %c0_i32 : i32
  }
  func.func @transform_7(%arg0: i32) -> (i32, i32) {
    %c0_i32 = arith.constant 0 : i32
    %c0_i32_0 = arith.constant 0 : i32
    return %c0_i32, %arg0 : i32, i32
  }
}

</mosaic_0001>

<bundles_post_ra>
// kernel: qnetwork_forward.1
= control target key start
LH: loop header
LB: loop body
LE: loop exit
PB: predicated region body
PF: predicated region fallthrough
CT: control target
= control target key end

     0   :  { %vm350_vm0 = vcmask 1043456   ;;  %v1515_v3 = vmov 0   ;;  %vm253_vm1 = vcmask 31744   ;;  %s2174_s0 = inlined_call_operand.vmem [shape: f32[4,128], index: 0, kind: input, shape index: {}]   ;;  %s2175_s1 = inlined_call_operand.vmem [shape: f32[256,4], index: 1, kind: input, shape index: {}]   ;;  %s2176_s2 = inlined_call_operand.vmem [shape: f32[256,1], index: 2, kind: input, shape index: {}]   ;;  %s2177_s3 = inlined_call_operand.vmem [shape: f32[256,256], index: 3, kind: input, shape index: {}]   ;;  %s2178_s4 = inlined_call_operand.vmem [shape: f32[256,1], index: 4, kind: input, shape index: {}]   ;;  %s2179_s5 = inlined_call_operand.vmem [shape: f32[1,256], index: 5, kind: input, shape index: {}]   ;;  %s2180_s6 = inlined_call_operand.<no memory space> [shape: f32[1], index: 6, kind: input, shape index: {}]   ;;  %s2181_s7 = inlined_call_operand.hbm [shape: f32[1,128], index: 7, kind: output, shape index: {}]  }
   0x1   :  { %v60_v0 = vld [vmem:[%s2174_s0] sm:$0xf]  ;;  %v63_v1 = vld [vmem:[%s2176_s2 + $0x10] sm:$0xff]  ;;  %1490 = vset.pattern.permute.xlu1 %v1515_v3  ;;  %1489 = vset.pattern.permute.xlu0 %v1515_v3  ;;  %v29_v5 = vld [vmem:[%s2175_s1 + $0x8] sm:$0xff] }
   0x2   :  { %v61_v2 = vld [vmem:[%s2176_s2] sm:$0xff]  ;;  %1324 = vmatprep.subr.msk.mxu0 %vm350_vm0, %v60_v0  ;;  %105 = vperm.xlu1 %1490, %v63_v1   ;;  %v64_v6 = vld [vmem:[%s2176_s2 + $0x18] sm:$0xff]  ;;  %v30_v7 = vld [vmem:[%s2175_s1 + $0x10] sm:$0xff] }
   0x3   :  { %v28_v4 = vld [vmem:[%s2175_s1] sm:$0xff]  ;;  %95 = vperm.xlu0 %1489, %v61_v2   ;;  %1325 = vmatpush3.msk.msra.mxu0 %vm350_vm0, %v60_v0  ;;  %v62_v8 = vld [vmem:[%s2176_s2 + $0x8] sm:$0xff]  ;;  %v31_v9 = vld [vmem:[%s2175_s1 + $0x18] sm:$0xff] }
   0x4   :  { %1326 = vmatprep.mubr.msk.f32.mxu0 %vm253_vm1, %v28_v4  ;;  %v66_v10 = vld [vmem:[%s2176_s2 + $0x28] sm:$0xff]  ;;  %v32_v11 = vld [vmem:[%s2175_s1 + $0x20] sm:$0xff]  ;;  %v68_v14 = vld [vmem:[%s2176_s2 + $0x38] sm:$0xff] }
   0x5   :  { %1327 = vmatmul.mubr.msk.f32.vlgmr.msra.gmra.mrb[0].mxu0 %vm253_vm1, %v29_v5  ;;  %v65_v12 = vld [vmem:[%s2176_s2 + $0x20] sm:$0xff]  ;;  %v33_v13 = vld [vmem:[%s2175_s1 + $0x28] sm:$0xff]  ;;  %v34_v15 = vld [vmem:[%s2175_s1 + $0x30] sm:$0xff] }
   0x6   :  { %110 = vperm.xlu1 %1490, %v64_v6   ;;  %1329 = vmatprep.mubr.msk.f32.mxu0 %vm253_vm1, %v30_v7  ;;  %v67_v16 = vld [vmem:[%s2176_s2 + $0x30] sm:$0xff]  ;;  %v35_v17 = vld [vmem:[%s2175_s1 + $0x38] sm:$0xff]  ;;  %v70_v18 = vld [vmem:[%s2176_s2 + $0x48] sm:$0xff] }
   0x7   :  { %100 = vperm.xlu0 %1489, %v62_v8   ;;  %v36_v19 = vld [vmem:[%s2175_s1 + $0x40] sm:$0xff]  ;;  %v37_v21 = vld [vmem:[%s2175_s1 + $0x48] sm:$0xff]  ;;  %v72_v22 = vld [vmem:[%s2176_s2 + $0x58] sm:$0xff] }
   0x8   :  { %v69_v20 = vld [vmem:[%s2176_s2 + $0x40] sm:$0xff]  ;;  %v38_v23 = vld [vmem:[%s2175_s1 + $0x50] sm:$0xff]  ;;  %v39_v25 = vld [vmem:[%s2175_s1 + $0x58] sm:$0xff] }
   0x9   :  { %1330 = vmatmul.mubr.msk.f32.gmra.mrb[2].mxu0 %vm253_vm1, %v31_v9  ;;  %v71_v24 = vld [vmem:[%s2176_s2 + $0x50] sm:$0xff]  ;;  %v74_v26 = vld [vmem:[%s2176_s2 + $0x68] sm:$0xff]  ;;  %v40_v27 = vld [vmem:[%s2175_s1 + $0x60] sm:$0xff] }
   0xa   :  { %120 = vperm.xlu1 %1490, %v66_v10   ;;  %1332 = vmatprep.mubr.msk.f32.mxu0 %vm253_vm1, %v32_v11  ;;  %v73_v28 = vld [vmem:[%s2176_s2 + $0x60] sm:$0xff]  ;;  %v41_v29 = vld [vmem:[%s2175_s1 + $0x68] sm:$0xff]  ;;  %v76_v30 = vld [vmem:[%s2176_s2 + $0x78] sm:$0xff] }
   0xb   :  { %115 = vperm.xlu0 %1489, %v65_v12   ;;  %v42_v31 = vld [vmem:[%s2175_s1 + $0x70] sm:$0xff]  ;;  %v43_v33 = vld [vmem:[%s2175_s1 + $0x78] sm:$0xff]  ;;  %v78_v34 = vld [vmem:[%s2176_s2 + $0x88] sm:$0xff] }
   0xc   :  { %v75_v32 = vld [vmem:[%s2176_s2 + $0x70] sm:$0xff]  ;;  %v44_v35 = vld [vmem:[%s2175_s1 + $0x80] sm:$0xff] }
   0xd   :  { %1333 = vmatmul.mubr.msk.f32.gmra.mrb[4].mxu0 %vm253_vm1, %v33_v13  ;;  %v77_v36 = vld [vmem:[%s2176_s2 + $0x80] sm:$0xff] }
   0xe   :  { %130 = vperm.xlu1 %1490, %v68_v14   ;;  %1335 = vmatprep.mubr.msk.f32.mxu0 %vm253_vm1, %v34_v15 }
   0xf   :  { %125 = vperm.xlu0 %1489, %v67_v16  }
  0x11   :  { %1336 = vmatmul.mubr.msk.f32.gmra.mrb[6].mxu0 %vm253_vm1, %v35_v17 }
  0x12   :  { %140 = vperm.xlu1 %1490, %v70_v18   ;;  %1338 = vmatprep.mubr.msk.f32.mxu0 %vm253_vm1, %v36_v19 }
  0x13   :  { %135 = vperm.xlu0 %1489, %v69_v20  }
  0x15   :  { %1339 = vmatmul.mubr.msk.f32.gmra.mrb[8].mxu0 %vm253_vm1, %v37_v21 }
  0x16   :  { %150 = vperm.xlu1 %1490, %v72_v22   ;;  %1341 = vmatprep.mubr.msk.f32.mxu0 %vm253_vm1, %v38_v23 }
  0x17   :  { %145 = vperm.xlu0 %1489, %v71_v24  }
  0x19   :  { %1342 = vmatmul.mubr.msk.f32.gmra.mrb[10].mxu0 %vm253_vm1, %v39_v25 }
  0x1a   :  { %160 = vperm.xlu1 %1490, %v74_v26   ;;  %1344 = vmatprep.mubr.msk.f32.mxu0 %vm253_vm1, %v40_v27 }
  0x1b   :  { %155 = vperm.xlu0 %1489, %v73_v28  }
  0x1d   :  { %1345 = vmatmul.mubr.msk.f32.gmra.mrb[12].mxu0 %vm253_vm1, %v41_v29 }
  0x1e   :  { %170 = vperm.xlu1 %1490, %v76_v30   ;;  %1347 = vmatprep.mubr.msk.f32.mxu0 %vm253_vm1, %v42_v31 }
  0x1f   :  { %165 = vperm.xlu0 %1489, %v75_v32  }
  0x20   :  { %13 = vsyncpa [#allocation4], 0  ;;  %v45_v37 = vld [vmem:[%s2175_s1 + $0x88] sm:$0xff]  ;;  %v80_v38 = vld [vmem:[%s2176_s2 + $0x98] sm:$0xff]  ;;  %v1516_v19 = vmov 0.0|0.0   ;;  %s1517_s16 = smov [#allocation3]  }
  0x21   :  { %1348 = vmatmul.mubr.msk.f32.gmra.mrb[14].mxu0 %vm253_vm1, %v43_v33  ;;  %v46_v39 = vld [vmem:[%s2175_s1 + $0x90] sm:$0xff]  ;;  %v47_v41 = vld [vmem:[%s2175_s1 + $0x98] sm:$0xff]  ;;  %v82_v42 = vld [vmem:[%s2176_s2 + $0xa8] sm:$0xff]  ;;  %1454 = vmatprep.subr.bf16.mxu1 %v1516_v19 }
  0x22   :  { %180 = vperm.xlu1 %1490, %v78_v34   ;;  %1350 = vmatprep.mubr.msk.f32.mxu0 %vm253_vm1, %v44_v35  ;;  %v79_v40 = vld [vmem:[%s2176_s2 + $0x90] sm:$0xff]  ;;  %v48_v43 = vld [vmem:[%s2175_s1 + $0xa0] sm:$0xff]  ;;  %v49_v45 = vld [vmem:[%s2175_s1 + $0xa8] sm:$0xff] }
  0x23   :  { %175 = vperm.xlu0 %1489, %v77_v36   ;;  %v81_v44 = vld [vmem:[%s2176_s2 + $0xa0] sm:$0xff]  ;;  %v84_v46 = vld [vmem:[%s2176_s2 + $0xb8] sm:$0xff]  ;;  %v50_v47 = vld [vmem:[%s2175_s1 + $0xb0] sm:$0xff]  ;;  %1374 = vmatprep.subr.bf16.mxu0 %v1516_v19 }
  0x24   :  { %v83_v48 = vld [vmem:[%s2176_s2 + $0xb0] sm:$0xff]  ;;  %v51_v49 = vld [vmem:[%s2175_s1 + $0xb8] sm:$0xff]  ;;  %v86_v50 = vld [vmem:[%s2176_s2 + $0xc8] sm:$0xff] }
  0x25   :  { %1351 = vmatmul.mubr.msk.f32.gmra.mrb[16].mxu0 %vm253_vm1, %v45_v37  ;;  %v52_v51 = vld [vmem:[%s2175_s1 + $0xc0] sm:$0xff]  ;;  %v53_v53 = vld [vmem:[%s2175_s1 + $0xc8] sm:$0xff]  ;;  %v88_v54 = vld [vmem:[%s2176_s2 + $0xd8] sm:$0xff] }
  0x26   :  { %190 = vperm.xlu1 %1490, %v80_v38   ;;  %1353 = vmatprep.mubr.msk.f32.mxu0 %vm253_vm1, %v46_v39  ;;  %v85_v52 = vld [vmem:[%s2176_s2 + $0xc0] sm:$0xff]  ;;  %v54_v55 = vld [vmem:[%s2175_s1 + $0xd0] sm:$0xff]  ;;  %v55_v57 = vld [vmem:[%s2175_s1 + $0xd8] sm:$0xff] }
  0x27   :  { %185 = vperm.xlu0 %1489, %v79_v40   ;;  %v87_v56 = vld [vmem:[%s2176_s2 + $0xd0] sm:$0xff]  ;;  %v90_v58 = vld [vmem:[%s2176_s2 + $0xe8] sm:$0xff]  ;;  %v56_v59 = vld [vmem:[%s2175_s1 + $0xe0] sm:$0xff] }
  0x28   :  { %v89_v60 = vld [vmem:[%s2176_s2 + $0xe0] sm:$0xff]  ;;  %v57_v61 = vld [vmem:[%s2175_s1 + $0xe8] sm:$0xff]  ;;  %v92_v62 = vld [vmem:[%s2176_s2 + $0xf8] sm:$0xff] }
  0x29   :  { %1354 = vmatmul.mubr.msk.f32.gmra.mrb[18].mxu0 %vm253_vm1, %v47_v41  ;;  %v58_v63 = vld [vmem:[%s2175_s1 + $0xf0] sm:$0xff]  ;;  %v59_v1 = vld [vmem:[%s2175_s1 + $0xf8] sm:$0xff]  ;;  %v692_v2 = vld [vmem:[%s2178_s4 + $0x88] sm:$0xff]  ;;  %s1215_s1 = sshll.u32 %s1517_s16, 4  ;;  %s1216_s1 = int_to_ptr.vmem [resolvable:$true] %s1215_s1 }
  0x2a   :  { %200 = vperm.xlu1 %1490, %v82_v42   ;;  %1356 = vmatprep.mubr.msk.f32.mxu0 %vm253_vm1, %v48_v43  ;;  %v91_v0 = vld [vmem:[%s2176_s2 + $0xf0] sm:$0xff]  ;;  %v691_v3 = vld [vmem:[%s2178_s4 + $0x80] sm:$0xff]  ;;  %v676_v4 = vld [vmem:[%s2178_s4 + $0x8] sm:$0xff]  ;;  %s1491_s17 = scalar_lea.vmem %s1216_s1, 16  ;;  %s1495_s18 = scalar_lea.vmem %s1216_s1, 32 }
  0x2b   :  { %195 = vperm.xlu0 %1489, %v81_v44   ;;  %v675_v5 = vld [vmem:[%s2178_s4] sm:$0xff]  ;;  %v694_v6 = vld [vmem:[%s2178_s4 + $0x98] sm:$0xff]  ;;  %v693_v7 = vld [vmem:[%s2178_s4 + $0x90] sm:$0xff]  ;;  %p1492_p0 = scmp.ne.s32.totalorder %s1216_s1, %s1491_s17  ;;  %p1496_p1 = scmp.lt.s32.totalorder %s1216_s1, %s1216_s1 }
  0x2c   :  { %v678_v8 = vld [vmem:[%s2178_s4 + $0x18] sm:$0xff]  ;;  %v677_v9 = vld [vmem:[%s2178_s4 + $0x10] sm:$0xff]  ;;  %v696_v10 = vld [vmem:[%s2178_s4 + $0xa8] sm:$0xff]  ;;  %p1497_p2 = scmp.lt.s32.totalorder %s1495_s18, %s1491_s17 }
  0x2d   :  { %1357 = vmatmul.mubr.msk.f32.gmra.mrb[20].mxu0 %vm253_vm1, %v49_v45  ;;  %v695_v11 = vld [vmem:[%s2178_s4 + $0xa0] sm:$0xff]  ;;  %v680_v12 = vld [vmem:[%s2178_s4 + $0x28] sm:$0xff]  ;;  %v698_v14 = vld [vmem:[%s2178_s4 + $0xb8] sm:$0xff] }
  0x2e   :  { %210 = vperm.xlu1 %1490, %v84_v46   ;;  %1359 = vmatprep.mubr.msk.f32.mxu0 %vm253_vm1, %v50_v47  ;;  %v679_v13 = vld [vmem:[%s2178_s4 + $0x20] sm:$0xff]  ;;  %v697_v15 = vld [vmem:[%s2178_s4 + $0xb0] sm:$0xff]  ;;  %v682_v16 = vld [vmem:[%s2178_s4 + $0x38] sm:$0xff]  ;;  %p1498_p3 = por %p1497_p2, %p1496_p1 }
  0x2f   :  { %205 = vperm.xlu0 %1489, %v83_v48   ;;  %v681_v17 = vld [vmem:[%s2178_s4 + $0x30] sm:$0xff]  ;;  %v700_v18 = vld [vmem:[%s2178_s4 + $0xc8] sm:$0xff]  ;;  %v699_v20 = vld [vmem:[%s2178_s4 + $0xc0] sm:$0xff] }
  0x30   :  { %v684_v21 = vld [vmem:[%s2178_s4 + $0x48] sm:$0xff]  ;;  %v683_v22 = vld [vmem:[%s2178_s4 + $0x40] sm:$0xff]  ;;  %v702_v23 = vld [vmem:[%s2178_s4 + $0xd8] sm:$0xff]  ;;  %p1499_p4 = pnand %p1498_p3, %p1492_p0 }
  0x31   :  { %1360 = vmatmul.mubr.msk.f32.gmra.mrb[22].mxu0 %vm253_vm1, %v51_v49  ;;  %v701_v24 = vld [vmem:[%s2178_s4 + $0xd0] sm:$0xff]  ;;  %v686_v25 = vld [vmem:[%s2178_s4 + $0x58] sm:$0xff]  ;;  %v704_v27 = vld [vmem:[%s2178_s4 + $0xe8] sm:$0xff] }
  0x32   :  { %220 = vperm.xlu1 %1490, %v86_v50   ;;  %1362 = vmatprep.mubr.msk.f32.mxu0 %vm253_vm1, %v52_v51  ;;  %v685_v26 = vld [vmem:[%s2178_s4 + $0x50] sm:$0xff]  ;;  %v703_v28 = vld [vmem:[%s2178_s4 + $0xe0] sm:$0xff]  ;;  %v688_v29 = vld [vmem:[%s2178_s4 + $0x68] sm:$0xff] }
  0x33   :  { %215 = vperm.xlu0 %1489, %v85_v52   ;;  %v687_v30 = vld [vmem:[%s2178_s4 + $0x60] sm:$0xff]  ;;  %v706_v31 = vld [vmem:[%s2178_s4 + $0xf8] sm:$0xff]  ;;  %v705_v32 = vld [vmem:[%s2178_s4 + $0xf0] sm:$0xff] }
  0x34   :  { %v690_v33 = vld [vmem:[%s2178_s4 + $0x78] sm:$0xff]  ;;  %v689_v34 = vld [vmem:[%s2178_s4 + $0x70] sm:$0xff]  ;;  %v612_v35 = vld [vmem:[%s2177_s3 + $0x8] sm:$0xff] }
  0x35   :  { %1363 = vmatmul.mubr.msk.f32.gmra.mrb[24].mxu0 %vm253_vm1, %v53_v53  ;;  %v642_v36 = vld [vmem:[%s2177_s3 + $0xf8] sm:$0xff] }
  0x36   :  { %230 = vperm.xlu1 %1490, %v88_v54   ;;  %1365 = vmatprep.mubr.msk.f32.mxu0 %vm253_vm1, %v54_v55 }
  0x37   :  { %225 = vperm.xlu0 %1489, %v87_v56   ;;  %1006 = vmatprep.mubr.f32.mxu1 %v642_v36 }
  0x39   :  { %1366 = vmatmul.mubr.msk.f32.gmra.mrb[26].mxu0 %vm253_vm1, %v55_v57 }
  0x3a   :  { %240 = vperm.xlu1 %1490, %v90_v58   ;;  %1368 = vmatprep.mubr.msk.f32.mxu0 %vm253_vm1, %v56_v59 }
  0x3b   :  { %235 = vperm.xlu0 %1489, %v89_v60  }
  0x3d   :  { %1369 = vmatmul.mubr.msk.f32.gmra.mrb[28].mxu0 %vm253_vm1, %v57_v61 }
  0x3e   :  { %250 = vperm.xlu1 %1490, %v92_v62   ;;  %1371 = vmatprep.mubr.msk.f32.mxu0 %vm253_vm1, %v58_v63 }
  0x3f   :  { %245 = vperm.xlu0 %1489, %v91_v0  }
  0x41   :  { %1372 = vmatmul.mubr.msk.f32.gmra.mrb[30].mxu0 %vm253_vm1, %v59_v1 }
  0x42   :  { %794 = vperm.xlu1 %1490, %v692_v2   ;;  %931 = vmatprep.mubr.f32.mxu0 %v612_v35 }
  0x43   :  { %789 = vperm.xlu0 %1489, %v691_v3  }
  0x46   :  { %714 = vperm.xlu1 %1490, %v676_v4  }
  0x47   :  { %709 = vperm.xlu0 %1489, %v675_v5  }
  0x4a   :  { %804 = vperm.xlu1 %1490, %v694_v6  }
  0x4b   :  { %799 = vperm.xlu0 %1489, %v693_v7  }
  0x4e   :  { %724 = vperm.xlu1 %1490, %v678_v8  }
  0x4f   :  { %719 = vperm.xlu0 %1489, %v677_v9  }
  0x52   :  { %814 = vperm.xlu1 %1490, %v696_v10  }
  0x53   :  { %809 = vperm.xlu0 %1489, %v695_v11  }
  0x56   :  { %734 = vperm.xlu1 %1490, %v680_v12  }
  0x57   :  { %729 = vperm.xlu0 %1489, %v679_v13  }
  0x5a   :  { %824 = vperm.xlu1 %1490, %v698_v14  }
  0x5b   :  { %819 = vperm.xlu0 %1489, %v697_v15  }
  0x5e   :  { %744 = vperm.xlu1 %1490, %v682_v16  }
  0x5f   :  { %739 = vperm.xlu0 %1489, %v681_v17  }
  0x62   :  { %834 = vperm.xlu1 %1490, %v700_v18  }
  0x63   :  { %829 = vperm.xlu0 %1489, %v699_v20  }
  0x66   :  { %754 = vperm.xlu1 %1490, %v684_v21  }
  0x67   :  { %749 = vperm.xlu0 %1489, %v683_v22  }
  0x6a   :  { %844 = vperm.xlu1 %1490, %v702_v23  }
  0x6b   :  { %839 = vperm.xlu0 %1489, %v701_v24  }
  0x6e   :  { %764 = vperm.xlu1 %1490, %v686_v25  }
  0x6f   :  { %759 = vperm.xlu0 %1489, %v685_v26  }
  0x72   :  { %854 = vperm.xlu1 %1490, %v704_v27  }
  0x73   :  { %849 = vperm.xlu0 %1489, %v703_v28  }
  0x76   :  { %774 = vperm.xlu1 %1490, %v688_v29  }
  0x77   :  { %769 = vperm.xlu0 %1489, %v687_v30  }
  0x7a   :  { %864 = vperm.xlu1 %1490, %v706_v31  }
  0x7b   :  { %859 = vperm.xlu0 %1489, %v705_v32  }
  0x7e   :  { %784 = vperm.xlu1 %1490, %v690_v33  }
  0x7f   :  { %779 = vperm.xlu0 %1489, %v689_v34  }
  0x81   :  { %v106_v37 = vpop.permute.xlu1 %105 }
  0x82   :  { %v96_v38 = vpop.permute.xlu0 %95 }
  0x85   :  { %v111_v39 = vpop.permute.xlu1 %110 }
  0x86   :  { %v101_v40 = vpop.permute.xlu0 %100 }
  0x89   :  { %v121_v41 = vpop.permute.xlu1 %120 }
  0x8a   :  { %v116_v42 = vpop.permute.xlu0 %115 }
  0x8d   :  { %v131_v43 = vpop.permute.xlu1 %130 }
  0x8e   :  { %v126_v44 = vpop.permute.xlu0 %125 }
  0x91   :  { %v141_v45 = vpop.permute.xlu1 %140 }
  0x92   :  { %v136_v46 = vpop.permute.xlu0 %135 }
  0x95   :  { %v151_v47 = vpop.permute.xlu1 %150 }
  0x96   :  { %v146_v49 = vpop.permute.xlu0 %145 }
  0x99   :  { %v161_v58 = vpop.permute.xlu1 %160 }
  0x9a   :  { %v156_v61 = vpop.permute.xlu0 %155 }
  0x9d   :  { %v171_v6 = vpop.permute.xlu1 %170 }
  0x9e   :  { %v166_v9 = vpop.permute.xlu0 %165 }
  0xa1   :  { %v181_v20 = vpop.permute.xlu1 %180 }
  0xa2   :  { %v176_v23 = vpop.permute.xlu0 %175 }
  0xa5   :  { %v191_v32 = vpop.permute.xlu1 %190 }
  0xa6   :  { %v186_v35 = vpop.permute.xlu0 %185 }
  0xd8   :  { %v1328_v48 = vpop.f32.mrb[0].mxu0 }
  0xd9   :  { %v426_v50 = vadd.f32 %v1328_v48, %v101_v40  ;;  %v420_v51 = vpop.f32.mrb[1].mxu0  ;;  %v196_v48 = vpop.permute.xlu0 %195 }
  0xda   :  { %v421_v52 = vadd.f32 %v420_v51, %v96_v38 }
  0xdb   :  { %v580_v53 = vmax.f32 %v426_v50, 0.0 }
  0xdc   :  { %v579_v54 = vmax.f32 %v421_v52, 0.0  ;;  %v1331_v55 = vpop.f32.mrb[2].mxu0 }
  0xdd   :  { %v436_v56 = vadd.f32 %v1331_v55, %v111_v39  ;;  %v430_v57 = vpop.f32.mrb[3].mxu0 }
  0xde   :  { %v1375_v59 = vpack.c.bf16 %v580_v53, %v579_v54  ;;  %v431_v60 = vadd.f32 %v430_v57, %v106_v37 }
  0xdf   :  { %v582_v62 = vmax.f32 %v436_v56, 0.0 }
  0xe0   :  { %v581_v63 = vmax.f32 %v431_v60, 0.0  ;;  %v1334_v0 = vpop.f32.mrb[4].mxu0  ;;  %1376 = vmatpush1.bf16.msra.mxu0 %v1375_v59  ;;  %1470 = vmatpush1.bf16.msra.mxu1 %v1375_v59  ;;  %v206_v60 = vpop.permute.xlu0 %205 }
  0xe1   :  { %v446_v1 = vadd.f32 %v1334_v0, %v121_v41  ;;  %v440_v2 = vpop.f32.mrb[5].mxu0  ;;  %1377 = vmatprep.subr.bf16.mxu0 %v1516_v19  ;;  %1455 = vmatprep.subr.bf16.mxu1 %v1516_v19 }
  0xe2   :  { %v1378_v3 = vpack.c.bf16 %v582_v62, %v581_v63  ;;  %v441_v4 = vadd.f32 %v440_v2, %v116_v42 }
  0xe3   :  { %v584_v5 = vmax.f32 %v446_v1, 0.0 }
  0xe4   :  { %v583_v7 = vmax.f32 %v441_v4, 0.0  ;;  %v1337_v8 = vpop.f32.mrb[6].mxu0  ;;  %1379 = vmatpush1.bf16.msra.mxu0 %v1378_v3  ;;  %1471 = vmatpush1.bf16.msra.mxu1 %v1378_v3 }
  0xe5   :  { %v456_v10 = vadd.f32 %v1337_v8, %v131_v43  ;;  %v450_v11 = vpop.f32.mrb[7].mxu0  ;;  %1380 = vmatprep.subr.bf16.mxu0 %v1516_v19  ;;  %1456 = vmatprep.subr.bf16.mxu1 %v1516_v19 }
  0xe6   :  { %v1381_v12 = vpack.c.bf16 %v584_v5, %v583_v7  ;;  %v451_v13 = vadd.f32 %v450_v11, %v126_v44 }
  0xe7   :  { %v586_v14 = vmax.f32 %v456_v10, 0.0 }
  0xe8   :  { %v585_v15 = vmax.f32 %v451_v13, 0.0  ;;  %v1340_v16 = vpop.f32.mrb[8].mxu0  ;;  %1382 = vmatpush1.bf16.msra.mxu0 %v1381_v12  ;;  %1472 = vmatpush1.bf16.msra.mxu1 %v1381_v12 }
  0xe9   :  { %v466_v17 = vadd.f32 %v1340_v16, %v141_v45  ;;  %v460_v18 = vpop.f32.mrb[9].mxu0  ;;  %1383 = vmatprep.subr.bf16.mxu0 %v1516_v19  ;;  %1457 = vmatprep.subr.bf16.mxu1 %v1516_v19  ;;  %v201_v45 = vpop.permute.xlu1 %200 }
  0xea   :  { %v1384_v21 = vpack.c.bf16 %v586_v14, %v585_v15  ;;  %v461_v22 = vadd.f32 %v460_v18, %v136_v46 }
  0xeb   :  { %v588_v24 = vmax.f32 %v466_v17, 0.0 }
  0xec   :  { %v587_v25 = vmax.f32 %v461_v22, 0.0  ;;  %v1343_v26 = vpop.f32.mrb[10].mxu0  ;;  %1385 = vmatpush1.bf16.msra.mxu0 %v1384_v21  ;;  %1473 = vmatpush1.bf16.msra.mxu1 %v1384_v21 }
  0xed   :  { %v476_v27 = vadd.f32 %v1343_v26, %v151_v47  ;;  %v470_v28 = vpop.f32.mrb[11].mxu0  ;;  %1386 = vmatprep.subr.bf16.mxu0 %v1516_v19  ;;  %1458 = vmatprep.subr.bf16.mxu1 %v1516_v19  ;;  %v211_v57 = vpop.permute.xlu1 %210 }
  0xee   :  { %v1387_v29 = vpack.c.bf16 %v588_v24, %v587_v25  ;;  %v471_v30 = vadd.f32 %v470_v28, %v146_v49 }
  0xef   :  { %v590_v31 = vmax.f32 %v476_v27, 0.0 }
  0xf0   :  { %v589_v33 = vmax.f32 %v471_v30, 0.0  ;;  %v1346_v34 = vpop.f32.mrb[12].mxu0  ;;  %1388 = vmatpush1.bf16.msra.mxu0 %v1387_v29  ;;  %1474 = vmatpush1.bf16.msra.mxu1 %v1387_v29 }
  0xf1   :  { %v486_v36 = vadd.f32 %v1346_v34, %v161_v58  ;;  %v480_v37 = vpop.f32.mrb[13].mxu0  ;;  %1389 = vmatprep.subr.bf16.mxu0 %v1516_v19  ;;  %1459 = vmatprep.subr.bf16.mxu1 %v1516_v19 }
  0xf2   :  { %v1390_v38 = vpack.c.bf16 %v590_v31, %v589_v33  ;;  %v481_v39 = vadd.f32 %v480_v37, %v156_v61 }
  0xf3   :  { %v592_v40 = vmax.f32 %v486_v36, 0.0 }
  0xf4   :  { %v591_v41 = vmax.f32 %v481_v39, 0.0  ;;  %v1349_v42 = vpop.f32.mrb[14].mxu0  ;;  %1391 = vmatpush1.bf16.msra.mxu0 %v1390_v38  ;;  %1475 = vmatpush1.bf16.msra.mxu1 %v1390_v38 }
  0xf5   :  { %v496_v43 = vadd.f32 %v1349_v42, %v171_v6  ;;  %v490_v44 = vpop.f32.mrb[15].mxu0  ;;  %1392 = vmatprep.subr.bf16.mxu0 %v1516_v19  ;;  %1460 = vmatprep.subr.bf16.mxu1 %v1516_v19  ;;  %v221_v6 = vpop.permute.xlu1 %220 }
  0xf6   :  { %v1393_v46 = vpack.c.bf16 %v592_v40, %v591_v41  ;;  %v491_v47 = vadd.f32 %v490_v44, %v166_v9  ;;  %v216_v9 = vpop.permute.xlu0 %215 }
  0xf7   :  { %v594_v49 = vmax.f32 %v496_v43, 0.0 }
  0xf8   :  { %v593_v50 = vmax.f32 %v491_v47, 0.0  ;;  %v1352_v51 = vpop.f32.mrb[16].mxu0  ;;  %1394 = vmatpush1.bf16.msra.mxu0 %v1393_v46  ;;  %1476 = vmatpush1.bf16.msra.mxu1 %v1393_v46 }
  0xf9   :  { %v506_v52 = vadd.f32 %v1352_v51, %v181_v20  ;;  %v500_v53 = vpop.f32.mrb[17].mxu0  ;;  %1395 = vmatprep.subr.bf16.mxu0 %v1516_v19  ;;  %1461 = vmatprep.subr.bf16.mxu1 %v1516_v19  ;;  %v231_v18 = vpop.permute.xlu1 %230 }
  0xfa   :  { %v1396_v54 = vpack.c.bf16 %v594_v49, %v593_v50  ;;  %v501_v55 = vadd.f32 %v500_v53, %v176_v23  ;;  %v226_v22 = vpop.permute.xlu0 %225 }
  0xfb   :  { %v596_v56 = vmax.f32 %v506_v52, 0.0 }
  0xfc   :  { %v595_v58 = vmax.f32 %v501_v55, 0.0  ;;  %v1355_v59 = vpop.f32.mrb[18].mxu0  ;;  %1397 = vmatpush1.bf16.msra.mxu0 %v1396_v54  ;;  %1477 = vmatpush1.bf16.msra.mxu1 %v1396_v54  ;;  %v611_v55 = vld [vmem:[%s2177_s3] sm:$0xff] }
  0xfd   :  { %v516_v61 = vadd.f32 %v1355_v59, %v191_v32  ;;  %v510_v62 = vpop.f32.mrb[19].mxu0  ;;  %1398 = vmatprep.subr.bf16.mxu0 %v1516_v19  ;;  %1462 = vmatprep.subr.bf16.mxu1 %v1516_v19  ;;  %v241_v32 = vpop.permute.xlu1 %240  ;;  %v643_v59 = vld [vmem:[%s2177_s3 + $0x100] sm:$0xff] }
  0xfe   :  { %v1399_v63 = vpack.c.bf16 %v596_v56, %v595_v58  ;;  %v511_v0 = vadd.f32 %v510_v62, %v186_v35  ;;  %v236_v35 = vpop.permute.xlu0 %235  ;;  %v641_v56 = vld [vmem:[%s2177_s3 + $0xf0] sm:$0xff]  ;;  %v644_v58 = vld [vmem:[%s2177_s3 + $0x108] sm:$0xff]  ;;  %v615_v62 = vld [vmem:[%s2177_s3 + $0x20] sm:$0xff] }
  0xff   :  { %v598_v1 = vmax.f32 %v516_v61, 0.0  ;;  %v646_v61 = vld [vmem:[%s2177_s3 + $0x118] sm:$0xff] }
 0x100   :  { %v597_v2 = vmax.f32 %v511_v0, 0.0  ;;  %v1358_v3 = vpop.f32.mrb[20].mxu0  ;;  %1400 = vmatpush1.bf16.msra.mxu0 %v1399_v63  ;;  %1478 = vmatpush1.bf16.msra.mxu1 %v1399_v63  ;;  %v645_v63 = vld [vmem:[%s2177_s3 + $0x110] sm:$0xff]  ;;  %v618_v0 = vld [vmem:[%s2177_s3 + $0x38] sm:$0xff] }
 0x101   :  { %v526_v4 = vadd.f32 %v1358_v3, %v201_v45  ;;  %v520_v5 = vpop.f32.mrb[21].mxu0  ;;  %1401 = vmatprep.subr.bf16.mxu0 %v1516_v19  ;;  %1463 = vmatprep.subr.bf16.mxu1 %v1516_v19  ;;  %v251_v44 = vpop.permute.xlu1 %250  ;;  %v647_v3 = vld [vmem:[%s2177_s3 + $0x120] sm:$0xff] }
 0x102   :  { %v1402_v7 = vpack.c.bf16 %v598_v1, %v597_v2  ;;  %v521_v8 = vadd.f32 %v520_v5, %v196_v48  ;;  %v246_v47 = vpop.permute.xlu0 %245  ;;  %v648_v1 = vld [vmem:[%s2177_s3 + $0x128] sm:$0xff]  ;;  %v617_v2 = vld [vmem:[%s2177_s3 + $0x30] sm:$0xff]  ;;  %v650_v5 = vld [vmem:[%s2177_s3 + $0x138] sm:$0xff] }
 0x103   :  { %v600_v10 = vmax.f32 %v526_v4, 0.0  ;;  %v620_v4 = vld [vmem:[%s2177_s3 + $0x48] sm:$0xff] }
 0x104   :  { %v599_v11 = vmax.f32 %v521_v8, 0.0  ;;  %v1361_v12 = vpop.f32.mrb[22].mxu0  ;;  %1403 = vmatpush1.bf16.msra.mxu0 %v1402_v7  ;;  %1479 = vmatpush1.bf16.msra.mxu1 %v1402_v7  ;;  %v649_v7 = vld [vmem:[%s2177_s3 + $0x130] sm:$0xff]  ;;  %v622_v8 = vld [vmem:[%s2177_s3 + $0x58] sm:$0xff] }
 0x105   :  { %v536_v13 = vadd.f32 %v1361_v12, %v211_v57  ;;  %v530_v14 = vpop.f32.mrb[23].mxu0  ;;  %1404 = vmatprep.subr.bf16.mxu0 %v1516_v19  ;;  %1464 = vmatprep.subr.bf16.mxu1 %v1516_v19  ;;  %v614_v57 = vld [vmem:[%s2177_s3 + $0x18] sm:$0xff]  ;;  %v624_v12 = vld [vmem:[%s2177_s3 + $0x68] sm:$0xff] }
 0x106   :  { %v1405_v15 = vpack.c.bf16 %v600_v10, %v599_v11  ;;  %v531_v16 = vadd.f32 %v530_v14, %v206_v60  ;;  %v616_v60 = vld [vmem:[%s2177_s3 + $0x28] sm:$0xff]  ;;  %v621_v10 = vld [vmem:[%s2177_s3 + $0x50] sm:$0xff]  ;;  %v651_v11 = vld [vmem:[%s2177_s3 + $0x140] sm:$0xff] }
 0x107   :  { %v602_v17 = vmax.f32 %v536_v13, 0.0  ;;  %v654_v13 = vld [vmem:[%s2177_s3 + $0x158] sm:$0xff]  ;;  %v623_v14 = vld [vmem:[%s2177_s3 + $0x60] sm:$0xff] }
 0x108   :  { %v601_v20 = vmax.f32 %v531_v16, 0.0  ;;  %v1364_v21 = vpop.f32.mrb[24].mxu0  ;;  %1406 = vmatpush1.bf16.msra.mxu0 %v1405_v15  ;;  %1480 = vmatpush1.bf16.msra.mxu1 %v1405_v15  ;;  %v653_v15 = vld [vmem:[%s2177_s3 + $0x150] sm:$0xff]  ;;  %v626_v16 = vld [vmem:[%s2177_s3 + $0x78] sm:$0xff] }
 0x109   :  { %v546_v23 = vadd.f32 %v1364_v21, %v221_v6  ;;  %v540_v24 = vpop.f32.mrb[25].mxu0  ;;  %1407 = vmatprep.subr.bf16.mxu0 %v1516_v19  ;;  %1465 = vmatprep.subr.bf16.mxu1 %v1516_v19  ;;  %v619_v6 = vld [vmem:[%s2177_s3 + $0x40] sm:$0xff]  ;;  %v628_v21 = vld [vmem:[%s2177_s3 + $0x88] sm:$0xff] }
 0x10a   :  { %v1408_v25 = vpack.c.bf16 %v602_v17, %v601_v20  ;;  %v541_v26 = vadd.f32 %v540_v24, %v216_v9  ;;  %v652_v9 = vld [vmem:[%s2177_s3 + $0x148] sm:$0xff]  ;;  %v655_v20 = vld [vmem:[%s2177_s3 + $0x160] sm:$0xff]  ;;  %v657_v24 = vld [vmem:[%s2177_s3 + $0x170] sm:$0xff] }
 0x10b   :  { %v604_v27 = vmax.f32 %v546_v23, 0.0  ;;  %v656_v17 = vld [vmem:[%s2177_s3 + $0x168] sm:$0xff]  ;;  %v627_v23 = vld [vmem:[%s2177_s3 + $0x80] sm:$0xff] }
 0x10c   :  { %v603_v28 = vmax.f32 %v541_v26, 0.0  ;;  %v1367_v29 = vpop.f32.mrb[26].mxu0  ;;  %1409 = vmatpush1.bf16.msra.mxu0 %v1408_v25  ;;  %1481 = vmatpush1.bf16.msra.mxu1 %v1408_v25  ;;  %v630_v25 = vld [vmem:[%s2177_s3 + $0x98] sm:$0xff]  ;;  %v660_v26 = vld [vmem:[%s2177_s3 + $0x188] sm:$0xff] }
 0x10d   :  { %v556_v30 = vadd.f32 %v1367_v29, %v231_v18  ;;  %v550_v31 = vpop.f32.mrb[27].mxu0  ;;  %1410 = vmatprep.subr.bf16.mxu0 %v1516_v19  ;;  %1466 = vmatprep.subr.bf16.mxu1 %v1516_v19  ;;  %v625_v18 = vld [vmem:[%s2177_s3 + $0x70] sm:$0xff]  ;;  %v632_v29 = vld [vmem:[%s2177_s3 + $0xa8] sm:$0xff] }
 0x10e   :  { %v1411_v33 = vpack.c.bf16 %v604_v27, %v603_v28  ;;  %v551_v34 = vadd.f32 %v550_v31, %v226_v22  ;;  %v658_v22 = vld [vmem:[%s2177_s3 + $0x178] sm:$0xff]  ;;  %v629_v27 = vld [vmem:[%s2177_s3 + $0x90] sm:$0xff]  ;;  %v659_v28 = vld [vmem:[%s2177_s3 + $0x180] sm:$0xff] }
 0x10f   :  { %v606_v36 = vmax.f32 %v556_v30, 0.0  ;;  %v662_v30 = vld [vmem:[%s2177_s3 + $0x198] sm:$0xff]  ;;  %v631_v31 = vld [vmem:[%s2177_s3 + $0xa0] sm:$0xff] }
 0x110   :  { %v605_v37 = vmax.f32 %v551_v34, 0.0  ;;  %v1370_v38 = vpop.f32.mrb[28].mxu0  ;;  %1412 = vmatpush1.bf16.msra.mxu0 %v1411_v33  ;;  %1482 = vmatpush1.bf16.msra.mxu1 %v1411_v33  ;;  %v634_v33 = vld [vmem:[%s2177_s3 + $0xb8] sm:$0xff]  ;;  %v664_v34 = vld [vmem:[%s2177_s3 + $0x1a8] sm:$0xff] }
 0x111   :  { %v566_v39 = vadd.f32 %v1370_v38, %v241_v32  ;;  %v560_v40 = vpop.f32.mrb[29].mxu0  ;;  %1413 = vmatprep.subr.bf16.mxu0 %v1516_v19  ;;  %1467 = vmatprep.subr.bf16.mxu1 %v1516_v19  ;;  %v661_v32 = vld [vmem:[%s2177_s3 + $0x190] sm:$0xff]  ;;  %v666_v38 = vld [vmem:[%s2177_s3 + $0x1b8] sm:$0xff] }
 0x112   :  { %v1414_v41 = vpack.c.bf16 %v606_v36, %v605_v37  ;;  %v561_v42 = vadd.f32 %v560_v40, %v236_v35  ;;  %v633_v35 = vld [vmem:[%s2177_s3 + $0xb0] sm:$0xff]  ;;  %v663_v36 = vld [vmem:[%s2177_s3 + $0x1a0] sm:$0xff]  ;;  %v636_v37 = vld [vmem:[%s2177_s3 + $0xc8] sm:$0xff] }
 0x113   :  { %v608_v43 = vmax.f32 %v566_v39, 0.0  ;;  %v635_v39 = vld [vmem:[%s2177_s3 + $0xc0] sm:$0xff]  ;;  %v665_v40 = vld [vmem:[%s2177_s3 + $0x1b0] sm:$0xff] }
 0x114   :  { %v607_v45 = vmax.f32 %v561_v42, 0.0  ;;  %v1373_v46 = vpop.f32.mrb[30].mxu0  ;;  %1415 = vmatpush1.bf16.msra.mxu0 %v1414_v41  ;;  %1483 = vmatpush1.bf16.msra.mxu1 %v1414_v41  ;;  %v638_v41 = vld [vmem:[%s2177_s3 + $0xd8] sm:$0xff]  ;;  %v668_v42 = vld [vmem:[%s2177_s3 + $0x1c8] sm:$0xff] }
 0x115   :  { %v576_v48 = vadd.f32 %v1373_v46, %v251_v44  ;;  %v570_v49 = vpop.f32.mrb[31].mxu0  ;;  %1416 = vmatprep.subr.bf16.mxu0 %v1516_v19  ;;  %1468 = vmatprep.subr.bf16.mxu1 %v1516_v19  ;;  %v667_v44 = vld [vmem:[%s2177_s3 + $0x1c0] sm:$0xff]  ;;  %v670_v46 = vld [vmem:[%s2177_s3 + $0x1d8] sm:$0xff] }
 0x116   :  { %v1417_v50 = vpack.c.bf16 %v608_v43, %v607_v45  ;;  %v571_v51 = vadd.f32 %v570_v49, %v246_v47  ;;  %v637_v43 = vld [vmem:[%s2177_s3 + $0xd0] sm:$0xff]  ;;  %v640_v45 = vld [vmem:[%s2177_s3 + $0xe8] sm:$0xff]  ;;  %v639_v47 = vld [vmem:[%s2177_s3 + $0xe0] sm:$0xff] }
 0x117   :  { %v610_v52 = vmax.f32 %v576_v48, 0.0  ;;  %v669_v48 = vld [vmem:[%s2177_s3 + $0x1d0] sm:$0xff]  ;;  %v672_v49 = vld [vmem:[%s2177_s3 + $0x1e8] sm:$0xff] }
 0x118   :  { %v609_v53 = vmax.f32 %v571_v51, 0.0  ;;  %1418 = vmatpush1.bf16.msra.mxu0 %v1417_v50  ;;  %1484 = vmatpush1.bf16.msra.mxu1 %v1417_v50  ;;  %v671_v50 = vld [vmem:[%s2177_s3 + $0x1e0] sm:$0xff]  ;;  %v674_v51 = vld [vmem:[%s2177_s3 + $0x1f8] sm:$0xff] }
 0x119   :  { %1419 = vmatprep.subr.bf16.mxu0 %v1516_v19  ;;  %1469 = vmatprep.subr.bf16.mxu1 %v1516_v19  ;;  %v613_v19 = vld [vmem:[%s2177_s3 + $0x10] sm:$0xff] }
 0x11a   :  { %v1420_v54 = vpack.c.bf16 %v610_v52, %v609_v53  ;;  %v673_v52 = vld [vmem:[%s2177_s3 + $0x1f0] sm:$0xff]  ;;  %v1128_v53 = vlaneseq }
 0x11c   :  { %1421 = vmatpush1.bf16.msra.mxu0 %v1420_v54  ;;  %1485 = vmatpush1.bf16.msra.mxu1 %v1420_v54  ;;  %v1129_v54 = vshrl.u32 %v1128_v53, 7 }
 0x11f   :  { %932 = vmatmul.mubr.f32.vlgmr.msra.gmra.mrb[32].mxu0 %v611_v55  ;;  %1007 = vmatmul.mubr.f32.vlgmr.msra.gmra.mrb[0].mxu1 %v641_v56  ;;  %v1134_v55 = vsub.s32 1, %v1129_v54  ;;  %v1124_v56 = vld [vmem:[%s2179_s5] sm:$0x3] }
 0x120   :  { %936 = vmatprep.mubr.f32.mxu0 %v614_v57  ;;  %1011 = vmatprep.mubr.f32.mxu1 %v644_v58  ;;  %v1130_v57 = vsub.s32 0, %v1129_v54 }
 0x121   :  { %v1135_v58 = vrot.slane %v1124_v56, %v1134_v55 }
 0x123   :  { %937 = vmatmul.mubr.f32.gmra.mrb[34].mxu0 %v613_v19  ;;  %1012 = vmatmul.mubr.f32.gmra.mrb[2].mxu1 %v643_v59  ;;  %v2108_v19 = vrot.slane %v1124_v56, %v1130_v57  ;;  %v795_v59 = vpop.permute.xlu1 %794 }
 0x124   :  { %941 = vmatprep.mubr.f32.mxu0 %v616_v60  ;;  %1016 = vmatprep.mubr.f32.mxu1 %v646_v61  ;;  %v790_v60 = vpop.permute.xlu0 %789 }
 0x127   :  { %942 = vmatmul.mubr.f32.gmra.mrb[36].mxu0 %v615_v62  ;;  %1017 = vmatmul.mubr.f32.gmra.mrb[4].mxu1 %v645_v63  ;;  %v715_v61 = vpop.permute.xlu1 %714 }
 0x128   :  { %946 = vmatprep.mubr.f32.mxu0 %v618_v0  ;;  %1021 = vmatprep.mubr.f32.mxu1 %v648_v1  ;;  %v710_v62 = vpop.permute.xlu0 %709 }
 0x12b   :  { %947 = vmatmul.mubr.f32.gmra.mrb[38].mxu0 %v617_v2  ;;  %1022 = vmatmul.mubr.f32.gmra.mrb[6].mxu1 %v647_v3  ;;  %v805_v63 = vpop.permute.xlu1 %804 }
 0x12c   :  { %951 = vmatprep.mubr.f32.mxu0 %v620_v4  ;;  %1026 = vmatprep.mubr.f32.mxu1 %v650_v5  ;;  %v800_v0 = vpop.permute.xlu0 %799 }
 0x12f   :  { %952 = vmatmul.mubr.f32.gmra.mrb[40].mxu0 %v619_v6  ;;  %1027 = vmatmul.mubr.f32.gmra.mrb[8].mxu1 %v649_v7  ;;  %v725_v1 = vpop.permute.xlu1 %724 }
 0x130   :  { %956 = vmatprep.mubr.f32.mxu0 %v622_v8  ;;  %1031 = vmatprep.mubr.f32.mxu1 %v652_v9  ;;  %v720_v2 = vpop.permute.xlu0 %719 }
 0x133   :  { %957 = vmatmul.mubr.f32.gmra.mrb[42].mxu0 %v621_v10  ;;  %1032 = vmatmul.mubr.f32.gmra.mrb[10].mxu1 %v651_v11  ;;  %v2110_v3 = vpop.permute.xlu1 %814 }
 0x134   :  { %961 = vmatprep.mubr.f32.mxu0 %v624_v12  ;;  %1036 = vmatprep.mubr.f32.mxu1 %v654_v13  ;;  %v2112_v4 = vpop.permute.xlu0 %809 }
 0x137   :  { %962 = vmatmul.mubr.f32.gmra.mrb[44].mxu0 %v623_v14  ;;  %1037 = vmatmul.mubr.f32.gmra.mrb[12].mxu1 %v653_v15  ;;  %v735_v5 = vpop.permute.xlu1 %734 }
 0x138   :  { %966 = vmatprep.mubr.f32.mxu0 %v626_v16  ;;  %1041 = vmatprep.mubr.f32.mxu1 %v656_v17  ;;  %v730_v6 = vpop.permute.xlu0 %729 }
 0x13b   :  { %967 = vmatmul.mubr.f32.gmra.mrb[46].mxu0 %v625_v18  ;;  %1042 = vmatmul.mubr.f32.gmra.mrb[14].mxu1 %v655_v20  ;;  %v2114_v7 = vpop.permute.xlu1 %824 }
 0x13c   :  { %971 = vmatprep.mubr.f32.mxu0 %v628_v21  ;;  %1046 = vmatprep.mubr.f32.mxu1 %v658_v22  ;;  %v2116_v8 = vpop.permute.xlu0 %819 }
 0x13f   :  { %972 = vmatmul.mubr.f32.gmra.mrb[48].mxu0 %v627_v23  ;;  %1047 = vmatmul.mubr.f32.gmra.mrb[16].mxu1 %v657_v24  ;;  %v2118_v9 = vpop.permute.xlu1 %744 }
 0x140   :  { %976 = vmatprep.mubr.f32.mxu0 %v630_v25  ;;  %1051 = vmatprep.mubr.f32.mxu1 %v660_v26  ;;  %v2120_v10 = vpop.permute.xlu0 %739 }
 0x143   :  { %977 = vmatmul.mubr.f32.gmra.mrb[50].mxu0 %v629_v27  ;;  %1052 = vmatmul.mubr.f32.gmra.mrb[18].mxu1 %v659_v28  ;;  %v2122_v11 = vpop.permute.xlu1 %834 }
 0x144   :  { %981 = vmatprep.mubr.f32.mxu0 %v632_v29  ;;  %1056 = vmatprep.mubr.f32.mxu1 %v662_v30  ;;  %v2124_v12 = vpop.permute.xlu0 %829 }
 0x147   :  { %982 = vmatmul.mubr.f32.gmra.mrb[52].mxu0 %v631_v31  ;;  %1057 = vmatmul.mubr.f32.gmra.mrb[20].mxu1 %v661_v32  ;;  %v2128_v24 = vpop.permute.xlu1 %754 }
 0x148   :  { %986 = vmatprep.mubr.f32.mxu0 %v634_v33  ;;  %1061 = vmatprep.mubr.f32.mxu1 %v664_v34  ;;  %v2130_v25 = vpop.permute.xlu0 %749 }
 0x14b   :  { %987 = vmatmul.mubr.f32.gmra.mrb[54].mxu0 %v633_v35  ;;  %1062 = vmatmul.mubr.f32.gmra.mrb[22].mxu1 %v663_v36 }
 0x14c   :  { %991 = vmatprep.mubr.f32.mxu0 %v636_v37  ;;  %1066 = vmatprep.mubr.f32.mxu1 %v666_v38 }
 0x14f   :  { %992 = vmatmul.mubr.f32.gmra.mrb[56].mxu0 %v635_v39  ;;  %1067 = vmatmul.mubr.f32.gmra.mrb[24].mxu1 %v665_v40 }
 0x150   :  { %996 = vmatprep.mubr.f32.mxu0 %v638_v41  ;;  %1071 = vmatprep.mubr.f32.mxu1 %v668_v42 }
 0x153   :  { %997 = vmatmul.mubr.f32.gmra.mrb[58].mxu0 %v637_v43  ;;  %1072 = vmatmul.mubr.f32.gmra.mrb[26].mxu1 %v667_v44  ;;  %v2132_v44 = vpop.permute.xlu1 %844 }
 0x154   :  { %1001 = vmatprep.mubr.f32.mxu0 %v640_v45  ;;  %1076 = vmatprep.mubr.f32.mxu1 %v670_v46  ;;  %v2134_v45 = vpop.permute.xlu0 %839 }
 0x157   :  { %1002 = vmatmul.mubr.f32.gmra.mrb[60].mxu0 %v639_v47  ;;  %1077 = vmatmul.mubr.f32.gmra.mrb[28].mxu1 %v669_v48 }
 0x158   :  { %1081 = vmatprep.mubr.f32.mxu1 %v672_v49  ;;  %1202 = vmatprep.mubr.f32.mxu0 %v1135_v58 }
 0x15b   :  { %1082 = vmatmul.mubr.f32.gmra.mrb[30].mxu1 %v671_v50 }
 0x15c   :  { %1086 = vmatprep.mubr.f32.mxu1 %v674_v51 }
 0x15f   :  { %1087 = vmatmul.mubr.f32.gmra.mrb[32].mxu1 %v673_v52 }
 0x1f2   :  { %v933_v13 = vpop.f32.mrb[32].mxu0  ;;  %v2126_v14 = vpop.f32.mrb[0].mxu1 }
 0x1f3   :  { %v1010_v15 = vpop.f32.mrb[1].mxu1  ;;  %v935_v16 = vpop.f32.mrb[33].mxu0  ;;  %v934_v17 = vadd.f32 %v933_v13, %v710_v62 }
 0x1f5   :  { %v1092_v26 = vmax.f32 %v934_v17, 0.0 }
 0x1f6   :  { %v938_v18 = vpop.f32.mrb[34].mxu0  ;;  %v1013_v20 = vpop.f32.mrb[2].mxu1 }
 0x1f7   :  { %v939_v21 = vadd.f32 %v938_v18, %v715_v61  ;;  %v1015_v22 = vpop.f32.mrb[3].mxu1  ;;  %v940_v23 = vpop.f32.mrb[35].mxu0  ;;  %v1014_v28 = vadd.f32 %v1013_v20, %v790_v60 }
 0x1f9   :  { %v1093_v27 = vmax.f32 %v939_v21, 0.0  ;;  %v1108_v35 = vmax.f32 %v1014_v28, 0.0 }
 0x1fa   :  { %v943_v29 = vpop.f32.mrb[36].mxu0  ;;  %v1018_v30 = vpop.f32.mrb[4].mxu1 }
 0x1fb   :  { %v1424_v31 = vpack.c.bf16 %v1093_v27, %v1092_v26  ;;  %v1019_v32 = vadd.f32 %v1018_v30, %v795_v59  ;;  %v1020_v33 = vpop.f32.mrb[5].mxu1  ;;  %v945_v34 = vpop.f32.mrb[37].mxu0  ;;  %v944_v36 = vadd.f32 %v943_v29, %v720_v2 }
 0x1fc   :  { %v2136_v2 = vpop.permute.xlu1 %764 }
 0x1fd   :  { %v1109_v37 = vmax.f32 %v1019_v32, 0.0  ;;  %v1094_v46 = vmax.f32 %v944_v36, 0.0 }
 0x1fe   :  { %v948_v38 = vpop.f32.mrb[38].mxu0  ;;  %v1023_v39 = vpop.f32.mrb[6].mxu1 }
 0x1ff   :  { %v1422_v40 = vpack.c.bf16 %v1109_v37, %v1108_v35  ;;  %v949_v41 = vadd.f32 %v948_v38, %v725_v1  ;;  %v1025_v42 = vpop.f32.mrb[7].mxu1  ;;  %v950_v43 = vpop.f32.mrb[39].mxu0  ;;  %v1024_v48 = vadd.f32 %v1023_v39, %v800_v0 }
 0x200   :  { %v760_v0 = vpop.permute.xlu0 %759 }
 0x201   :  { %v1095_v47 = vmax.f32 %v949_v41, 0.0  ;;  %1423 = vmatprep.subr.bf16.mxu0 %v1422_v40  ;;  %v1110_v55 = vmax.f32 %v1024_v48, 0.0 }
 0x202   :  { %v953_v49 = vpop.f32.mrb[40].mxu0  ;;  %v1028_v50 = vpop.f32.mrb[8].mxu1  ;;  %1425 = vmatpush3.bf16.msra.mxu0 %v1424_v31 }
 0x203   :  { %v1428_v51 = vpack.c.bf16 %v1095_v47, %v1094_v46  ;;  %v1029_v52 = vadd.f32 %v1028_v50, %v805_v63  ;;  %v1030_v53 = vpop.f32.mrb[9].mxu1  ;;  %v955_v54 = vpop.f32.mrb[41].mxu0  ;;  %v954_v56 = vadd.f32 %v953_v49, %v730_v6 }
 0x204   :  { %v2142_v31 = vpop.permute.xlu1 %854  ;;  %v2144_v32 = vpop.permute.xlu0 %849 }
 0x205   :  { %v1111_v57 = vmax.f32 %v1029_v52, 0.0  ;;  %v1096_v13 = vmax.f32 %v954_v56, 0.0 }
 0x206   :  { %v958_v58 = vpop.f32.mrb[42].mxu0  ;;  %v1033_v59 = vpop.f32.mrb[10].mxu1 }
 0x207   :  { %v1426_v60 = vpack.c.bf16 %v1111_v57, %v1110_v55  ;;  %v959_v61 = vadd.f32 %v958_v58, %v735_v5  ;;  %v1035_v62 = vpop.f32.mrb[11].mxu1  ;;  %v960_v1 = vpop.f32.mrb[43].mxu0  ;;  %v1034_v16 = vadd.f32 %v1033_v59, %v2112_v4 }
 0x208   :  { %v775_v49 = vpop.permute.xlu1 %774  ;;  %v770_v50 = vpop.permute.xlu0 %769 }
 0x209   :  { %v1097_v15 = vmax.f32 %v959_v61, 0.0  ;;  %1427 = vmatprep.subr.bf16.mxu0 %v1426_v60  ;;  %v1112_v22 = vmax.f32 %v1034_v16, 0.0 }
 0x20a   :  { %v963_v63 = vpop.f32.mrb[44].mxu0  ;;  %v1038_v17 = vpop.f32.mrb[12].mxu1  ;;  %1429 = vmatpush3.bf16.msra.mxu0 %v1428_v51 }
 0x20b   :  { %v1432_v18 = vpack.c.bf16 %v1097_v15, %v1096_v13  ;;  %v1039_v6 = vadd.f32 %v1038_v17, %v2110_v3  ;;  %v1040_v20 = vpop.f32.mrb[13].mxu1  ;;  %v965_v21 = vpop.f32.mrb[45].mxu0  ;;  %v964_v5 = vadd.f32 %v963_v63, %v2120_v10 }
 0x20c   :  { %v860_v16 = vpop.permute.xlu0 %859 }
 0x20d   :  { %v1113_v23 = vmax.f32 %v1039_v6, 0.0  ;;  %v1098_v33 = vmax.f32 %v964_v5, 0.0 }
 0x20e   :  { %v968_v26 = vpop.f32.mrb[46].mxu0  ;;  %v1043_v27 = vpop.f32.mrb[14].mxu1 }
 0x20f   :  { %v1430_v28 = vpack.c.bf16 %v1113_v23, %v1112_v22  ;;  %v969_v29 = vadd.f32 %v968_v26, %v2118_v9  ;;  %v1045_v30 = vpop.f32.mrb[15].mxu1  ;;  %v970_v4 = vpop.f32.mrb[47].mxu0  ;;  %v1044_v3 = vadd.f32 %v1043_v27, %v2116_v8 }
 0x211   :  { %v1099_v34 = vmax.f32 %v969_v29, 0.0  ;;  %1431 = vmatprep.subr.bf16.mxu0 %v1430_v28  ;;  %v1114_v9 = vmax.f32 %v1044_v3, 0.0 }
 0x212   :  { %v973_v35 = vpop.f32.mrb[48].mxu0  ;;  %v1048_v36 = vpop.f32.mrb[16].mxu1  ;;  %1433 = vmatpush3.bf16.msra.mxu0 %v1432_v18 }
 0x213   :  { %v1436_v10 = vpack.c.bf16 %v1099_v34, %v1098_v33  ;;  %v1049_v37 = vadd.f32 %v1048_v36, %v2114_v7  ;;  %v1050_v38 = vpop.f32.mrb[17].mxu1  ;;  %v975_v39 = vpop.f32.mrb[49].mxu0  ;;  %v974_v40 = vadd.f32 %v973_v35, %v2130_v25 }
 0x215   :  { %v1115_v41 = vmax.f32 %v1049_v37, 0.0  ;;  %v1100_v51 = vmax.f32 %v974_v40, 0.0 }
 0x216   :  { %v978_v42 = vpop.f32.mrb[50].mxu0  ;;  %v1053_v43 = vpop.f32.mrb[18].mxu1 }
 0x217   :  { %v1434_v46 = vpack.c.bf16 %v1115_v41, %v1114_v9  ;;  %v979_v47 = vadd.f32 %v978_v42, %v2128_v24  ;;  %v1055_v48 = vpop.f32.mrb[19].mxu1  ;;  %v980_v8 = vpop.f32.mrb[51].mxu0  ;;  %v1054_v53 = vadd.f32 %v1053_v43, %v2124_v12 }
 0x218   :  { %v865_v12 = vpop.permute.xlu1 %864 }
 0x219   :  { %v1101_v52 = vmax.f32 %v979_v47, 0.0  ;;  %1435 = vmatprep.subr.bf16.mxu0 %v1434_v46  ;;  %v1116_v58 = vmax.f32 %v1054_v53, 0.0 }
 0x21a   :  { %v983_v7 = vpop.f32.mrb[52].mxu0  ;;  %v1058_v54 = vpop.f32.mrb[20].mxu1  ;;  %1437 = vmatpush3.bf16.msra.mxu0 %v1436_v10 }
 0x21b   :  { %v1440_v55 = vpack.c.bf16 %v1101_v52, %v1100_v51  ;;  %v1059_v25 = vadd.f32 %v1058_v54, %v2122_v11  ;;  %v1060_v56 = vpop.f32.mrb[21].mxu1  ;;  %v985_v57 = vpop.f32.mrb[53].mxu0  ;;  %v984_v59 = vadd.f32 %v983_v7, %v760_v0 }
 0x21c   :  { %v785_v33 = vpop.permute.xlu1 %784 }
 0x21d   :  { %v1117_v24 = vmax.f32 %v1059_v25, 0.0  ;;  %v1102_v63 = vmax.f32 %v984_v59, 0.0  ;;  %v1009_v34 = vadd.f32 %v2126_v14, %v785_v33 }
 0x21e   :  { %v988_v60 = vpop.f32.mrb[54].mxu0  ;;  %v1063_v61 = vpop.f32.mrb[22].mxu1 }
 0x21f   :  { %v1438_v62 = vpack.c.bf16 %v1117_v24, %v1116_v58  ;;  %v989_v1 = vadd.f32 %v988_v60, %v2136_v2  ;;  %v1065_v13 = vpop.f32.mrb[23].mxu1  ;;  %v990_v15 = vpop.f32.mrb[55].mxu0  ;;  %v1064_v18 = vadd.f32 %v1063_v61, %v2134_v45  ;;  %v1107_v41 = vmax.f32 %v1009_v34, 0.0 }
 0x220   :  { %v780_v45 = vpop.permute.xlu0 %779 }
 0x221   :  { %v1103_v17 = vmax.f32 %v989_v1, 0.0  ;;  %1439 = vmatprep.subr.bf16.mxu0 %v1438_v62  ;;  %v1118_v5 = vmax.f32 %v1064_v18, 0.0 }
 0x222   :  { %v993_v11 = vpop.f32.mrb[56].mxu0  ;;  %v1068_v6 = vpop.f32.mrb[24].mxu1  ;;  %1441 = vmatpush3.bf16.msra.mxu0 %v1440_v55  ;;  %v1126_v55 = vstv %s2180_s6 }
 0x223   :  { %v1444_v20 = vpack.c.bf16 %v1103_v17, %v1102_v63  ;;  %v1069_v0 = vadd.f32 %v1068_v6, %v2132_v44  ;;  %v1070_v21 = vpop.f32.mrb[25].mxu1  ;;  %v995_v22 = vpop.f32.mrb[57].mxu0  ;;  %v994_v23 = vadd.f32 %v993_v11, %v770_v50 }
 0x225   :  { %v1119_v2 = vmax.f32 %v1069_v0, 0.0  ;;  %v1104_v3 = vmax.f32 %v994_v23, 0.0 }
 0x226   :  { %v998_v26 = vpop.f32.mrb[58].mxu0  ;;  %v1073_v27 = vpop.f32.mrb[26].mxu1 }
 0x227   :  { %v1442_v28 = vpack.c.bf16 %v1119_v2, %v1118_v5  ;;  %v999_v29 = vadd.f32 %v998_v26, %v775_v49  ;;  %v1075_v30 = vpop.f32.mrb[27].mxu1  ;;  %v1000_v4 = vpop.f32.mrb[59].mxu0  ;;  %v1074_v36 = vadd.f32 %v1073_v27, %v2144_v32 }
 0x229   :  { %v1105_v35 = vmax.f32 %v999_v29, 0.0  ;;  %1443 = vmatprep.subr.bf16.mxu0 %v1442_v28  ;;  %v1120_v42 = vmax.f32 %v1074_v36, 0.0 }
 0x22a   :  { %v1003_v44 = vpop.f32.mrb[60].mxu0  ;;  %v1078_v10 = vpop.f32.mrb[28].mxu1  ;;  %1445 = vmatpush3.bf16.msra.mxu0 %v1444_v20 }
 0x22b   :  { %v1448_v37 = vpack.c.bf16 %v1105_v35, %v1104_v3  ;;  %v1004_v38 = vadd.f32 %v1003_v44, %v780_v45  ;;  %v1079_v39 = vadd.f32 %v1078_v10, %v2142_v31  ;;  %v1080_v9 = vpop.f32.mrb[29].mxu1  ;;  %v1005_v40 = vpop.f32.mrb[61].mxu0 }
 0x22d   :  { %v1106_v43 = vmax.f32 %v1004_v38, 0.0  ;;  %v1121_v46 = vmax.f32 %v1079_v39, 0.0 }
 0x22e   :  { %v1083_v47 = vpop.f32.mrb[30].mxu1 }
 0x22f   :  { %v1452_v14 = vpack.c.bf16 %v1107_v41, %v1106_v43  ;;  %v1446_v48 = vpack.c.bf16 %v1121_v46, %v1120_v42  ;;  %v1085_v8 = vpop.f32.mrb[31].mxu1  ;;  %v1084_v49 = vadd.f32 %v1083_v47, %v860_v16 }
 0x231   :  { %1447 = vmatprep.subr.bf16.mxu0 %v1446_v48  ;;  %v1122_v52 = vmax.f32 %v1084_v49, 0.0 }
 0x232   :  { %v1088_v32 = vpop.f32.mrb[32].mxu1  ;;  %1449 = vmatpush3.bf16.msra.mxu0 %v1448_v37 }
 0x233   :  { %v1089_v50 = vadd.f32 %v1088_v32, %v865_v12  ;;  %v1090_v51 = vpop.f32.mrb[33].mxu1 }
 0x235   :  { %v1123_v53 = vmax.f32 %v1089_v50, 0.0 }
 0x237   :  { %v1450_v7 = vpack.c.bf16 %v1123_v53, %v1122_v52 }
 0x239   :  { %1451 = vmatprep.subr.bf16.mxu0 %v1450_v7 }
 0x23a   :  { %1453 = vmatpush3.bf16.msra.mxu0 %v1452_v14 }
 0x23d   :  { %1203 = vmatmul.mubr.f32.vlgmr.msra.gmra.mrb[62].mxu0 %v2108_v19 }
 0x310   :  { %v1321_v31 = vpop.f32.mrb[62].mxu0 }
 0x311   :  { %v1322_v54 = vpop.f32.mrb[63].mxu0 }
 0x312   :  { %v1323_v25 = vadd.f32 %v1322_v54, %v1321_v31 }
 0x314   :  { %v1205_v56 = vadd.f32 %v1323_v25, %v1126_v55 }
 0x316   :  { %1208 = vst [vmem:[#allocation3] sm:$0x1] %v1205_v56 }
 0x317   :  { %1502 = shalt.err (!%p1499_p4)
}
 0x318   :  { %s1503_s21 = scalar_lea.hbm %s2181_s7, 16 }
 0x319   :  { %p1504_p5 = scmp.ne.s32.totalorder %s2181_s7, %s1503_s21  ;;  %p1507_p6 = scmp.lt.u32.totalorder %s1503_s21, %s2181_s7 }
 0x31b   :  { %p1509_p7 = pnand %p1507_p6, %p1504_p5 }
 0x31d   :  { %1512 = shalt.err (!%p1509_p7)
}
 0x31e   :  { %1218 = dma.vmem_to_hbm [thread:$0]  %s1216_s1, 16, %s2181_s7, [#allocation4]  }
 0x31f   :  { %1513 = dma.done.wait [#allocation4], 16  }
 0x320   :  { %1514 = vsyncadd [#allocation4], 4294967280 }
 0x321   :  { %1222 = vsyncpa [#allocation4], 1 }

</bundles_post_ra>
